<compile_context>
chip_gen: v7x
topology: tpu7x:2x2x1
jax: 0.10.0
libtpu: 0.0.40
codegen_flags: <defaults>
</compile_context>

<pallas_src>
import math
import functools

import jax
import jax.numpy as jnp
from jax import lax
from jax.experimental import pallas as pl
from jax.experimental.pallas import tpu as pltpu


def _round_up(x, m):
    return (x + m - 1) // m * m


def _pad_to(x, shape):
    pads = [(0, t - s) for s, t in zip(x.shape, shape)]
    if all(p == (0, 0) for p in pads):
        return x
    return jnp.pad(x, pads)


def _gcn_kernel(*refs, add_self, normalize):
    if add_self:
        adj_ref, hc_ref, hf_ref, w_ref, o_ref = refs
    else:
        adj_ref, hc_ref, w_ref, o_ref = refs
        hf_ref = None

    adj = adj_ref[...]                      # (Bt, Nf, Nc)   (f32 or bf16 feed)
    hc = hc_ref[...]                        # (Bt, Nc, Din)
    w = w_ref[...]                          # (Din, Dout)

    # 1) Message passing: batched (Nf x Nc) @ (Nc x Din), f32 MXU accumulation.
    tmp = lax.dot_general(
        adj, hc,
        dimension_numbers=(((2,), (1,)), ((0,), (0,))),
        preferred_element_type=jnp.float32)                   # (Bt, Nf, Din) f32
    if add_self:
        tmp = tmp + hf_ref[...].astype(jnp.float32)           # self-add in f32

    bt, nf, din = tmp.shape
    # 2) Weight transform: flatten (Bt, Nf) so the MXU sees >=128/256 rows at once.
    #    Leading-dim-only reshape (Nf_p multiple of 16) -> no (8,128) tile crossing.
    flat = tmp.reshape(bt * nf, din).astype(w.dtype)
    out = jnp.dot(flat, w, preferred_element_type=jnp.float32)  # (Bt*Nf, Dout) f32
    out = jnp.maximum(out, 0.0)                                  # ReLU in f32
    out = out.reshape(bt, nf, -1)

    if normalize:
        # F.normalize(dim=1): L2 norm over the node axis, eps clamp on the norm.
        # 1/max(sqrt(ss), 1e-12) == rsqrt(max(ss, 1e-24)); single EUP rsqrt.
        sumsq = jnp.sum(out * out, axis=1, keepdims=True)        # XLU reduce
        out = out * lax.rsqrt(jnp.maximum(sumsq, 1e-24))

    o_ref[...] = out.astype(o_ref.dtype)


def inter_channel_gcn(H_fine, H_coarse, inter_channel_adj, weight,
                      add_self=True, normalize=False,
                      mxu_dtype=None, batch_tile=None):
    B, Nf, Din = H_fine.shape
    _, Nc, _ = H_coarse.shape
    Dout = weight.shape[1]
    out_dtype = H_fine.dtype

    LANE, SUB = 128, 16
    Nf_p = _round_up(Nf, SUB)
    Nc_p = _round_up(Nc, LANE)
    Din_p = _round_up(Din, LANE)
    Dout_p = _round_up(Dout, LANE)

    feed_dtype = jnp.dtype(mxu_dtype) if mxu_dtype is not None else jnp.dtype(out_dtype)
    itemsize = feed_dtype.itemsize

    # Choose Bt so Bt*Nf fills MXU rows (>=256) while staying under a conservative
    # double-buffered VMEM budget (keeps pipelining alive on v7x's 64 MiB VMEM).
    if batch_tile is None:
        bt = max(1, min(B, -(-256 // Nf_p)))

        def _footprint(bt_):
            per_b = (Nf_p * Nc_p + Nc_p * Din_p) * itemsize
            if add_self:
                per_b += Nf_p * Din_p * 4                # H_fine stays f32
            per_b += Nf_p * Dout_p * jnp.dtype(out_dtype).itemsize
            return 2 * (bt_ * per_b + Din_p * Dout_p * itemsize)

        VMEM_BUDGET = 16 * 1024 * 1024
        while bt > 1 and _footprint(bt) > VMEM_BUDGET:
            bt -= 1
    else:
        bt = int(batch_tile)
    B_p = _round_up(B, bt)

    adj_p = _pad_to(inter_channel_adj, (B_p, Nf_p, Nc_p)).astype(feed_dtype)
    hc_p = _pad_to(H_coarse, (B_p, Nc_p, Din_p)).astype(feed_dtype)
    w_p = _pad_to(weight, (Din_p, Dout_p)).astype(feed_dtype)

    in_specs = [
        pl.BlockSpec((bt, Nf_p, Nc_p), lambda b: (b, 0, 0)),    # adj
        pl.BlockSpec((bt, Nc_p, Din_p), lambda b: (b, 0, 0)),   # H_coarse
    ]
    args = [adj_p, hc_p]
    if add_self:
        hf_p = _pad_to(H_fine, (B_p, Nf_p, Din_p))              # keep f32 for the add
        in_specs.append(pl.BlockSpec((bt, Nf_p, Din_p), lambda b: (b, 0, 0)))
        args.append(hf_p)
    in_specs.append(pl.BlockSpec((Din_p, Dout_p), lambda b: (0, 0)))  # weight (resident)
    args.append(w_p)

    kernel = functools.partial(_gcn_kernel, add_self=add_self, normalize=normalize)

    out_p = pl.pallas_call(
        kernel,
        out_shape=jax.ShapeDtypeStruct((B_p, Nf_p, Dout_p), out_dtype),
        grid_spec=pltpu.PrefetchScalarGridSpec(
            num_scalar_prefetch=0,
            grid=(B_p // bt,),
            in_specs=in_specs,
            out_specs=pl.BlockSpec((bt, Nf_p, Dout_p), lambda b: (b, 0, 0)),
        ),
        compiler_params=pltpu.CompilerParams(
            dimension_semantics=("parallel",),
            vmem_limit_bytes=48 * 1024 * 1024,
        ),
    )(*args)

    return out_p[:B, :Nf, :Dout]


def _reference(H_fine, H_coarse, adj, weight, add_self=True, normalize=False):
    out = jnp.matmul(adj, H_coarse)
    if add_self:
        out = out + H_fine
    out = jnp.matmul(out, weight)
    out = jax.nn.relu(out)
    if normalize:
        norm = jnp.sqrt(jnp.sum(out * out, axis=1, keepdims=True))
        out = out / jnp.maximum(norm, 1e-12)
    return out


if __name__ == "__main__":
    # Small deterministic example shapes implied by the forward pass.
    B, Nf, Nc = 2, 16, 8
    input_dim, output_dim = 32, 32

    key = jax.random.PRNGKey(0)
    k_hf, k_hc, k_adj, k_w = jax.random.split(key, 4)

    H_fine = jax.random.normal(k_hf, (B, Nf, input_dim), dtype=jnp.float32)
    H_coarse = jax.random.normal(k_hc, (B, Nc, input_dim), dtype=jnp.float32)
    inter_channel_adj = jax.random.normal(k_adj, (B, Nf, Nc), dtype=jnp.float32)

    # Deterministic Xavier-normal init of the (input_dim, output_dim) weight.
    xavier_std = math.sqrt(2.0 / (input_dim + output_dim))
    weight = xavier_std * jax.random.normal(k_w, (input_dim, output_dim),
                                            dtype=jnp.float32)

    # 1) f32 MXU feed, add_self=True, normalize=False (default module config).
    out = jax.block_until_ready(
        inter_channel_gcn(H_fine, H_coarse, inter_channel_adj, weight,
                          add_self=True, normalize=False))
    ref = _reference(H_fine, H_coarse, inter_channel_adj, weight, True, False)
    assert out.shape == (B, Nf, output_dim)
    assert jnp.allclose(out, ref, atol=1e-5, rtol=1e-5)

    # 2) add_self=False path.
    out2 = jax.block_until_ready(
        inter_channel_gcn(H_fine, H_coarse, inter_channel_adj, weight,
                          add_self=False, normalize=False))
    ref2 = _reference(H_fine, H_coarse, inter_channel_adj, weight, False, False)
    assert jnp.allclose(out2, ref2, atol=1e-5, rtol=1e-5)

    # 3) normalize=True path (exact rsqrt epilogue -> full f32 tolerance).
    out3 = jax.block_until_ready(
        inter_channel_gcn(H_fine, H_coarse, inter_channel_adj, weight,
                          add_self=True, normalize=True))
    ref3 = _reference(H_fine, H_coarse, inter_channel_adj, weight, True, True)
    assert jnp.allclose(out3, ref3, atol=1e-5, rtol=1e-5)

    # 4) bf16 MXU feed with f32 accumulation (fast path on v6e/v7x).
    out4 = jax.block_until_ready(
        inter_channel_gcn(H_fine, H_coarse, inter_channel_adj, weight,
                          add_self=True, normalize=False,
                          mxu_dtype=jnp.bfloat16))
    assert jnp.allclose(out4, ref, atol=0.15, rtol=0.1)

    print("KERNEL_OK")
</pallas_src>

<mosaic_0001>
module attributes {stable_mosaic.version = 11 : i64} {
  func.func @_gcn_kernel(%arg0: i32, %arg1: memref<2x16x128xf32, #tpu.memory_space<vmem>>, %arg2: memref<2x128x128xf32, #tpu.memory_space<vmem>>, %arg3: memref<2x16x128xf32, #tpu.memory_space<vmem>>, %arg4: memref<128x128xf32, #tpu.memory_space<vmem>>, %arg5: memref<2x16x128xf32, #tpu.memory_space<vmem>>) attributes {dimension_semantics = [#tpu.dimension_semantics<parallel>], iteration_bounds = array<i64: 1>, scalar_prefetch = 0 : i64, scratch_operands = 0 : i64, tpu.core_type = #tpu.core_type<tc>, window_params = [{transform_indices = @transform_0, window_bounds = array<i64: 2, 16, 128>}, {transform_indices = @transform_1, window_bounds = array<i64: 2, 128, 128>}, {transform_indices = @transform_2, window_bounds = array<i64: 2, 16, 128>}, {pipeline_mode = #tpu.pipeline_mode<synchronous>, transform_indices = @transform_3, window_bounds = array<i64: 128, 128>}, {transform_indices = @transform_4, window_bounds = array<i64: 2, 16, 128>}]} {
    %c0 = arith.constant 0 : index
    %c0_0 = arith.constant 0 : index
    %c0_1 = arith.constant 0 : index
    %0 = vector.load %arg1[%c0, %c0_0, %c0_1] : memref<2x16x128xf32, #tpu.memory_space<vmem>>, vector<2x16x128xf32>
    %c0_2 = arith.constant 0 : index
    %c0_3 = arith.constant 0 : index
    %c0_4 = arith.constant 0 : index
    %1 = vector.load %arg2[%c0_2, %c0_3, %c0_4] : memref<2x128x128xf32, #tpu.memory_space<vmem>>, vector<2x128x128xf32>
    %c0_5 = arith.constant 0 : index
    %c0_6 = arith.constant 0 : index
    %2 = vector.load %arg4[%c0_5, %c0_6] : memref<128x128xf32, #tpu.memory_space<vmem>>, vector<128x128xf32>
    %cst = arith.constant dense<0.000000e+00> : vector<2x16x128xf32>
    %3 = tpu.matmul %0, %1, %cst {dimension_numbers = #tpu.dot_dimension_numbers<[2], [1], [1], [2], [0, 0, 0, 1, 1, 2], [0], [0]>} : vector<2x16x128xf32>, vector<2x128x128xf32>, vector<2x16x128xf32> -> vector<2x16x128xf32>
    %c0_7 = arith.constant 0 : index
    %c0_8 = arith.constant 0 : index
    %c0_9 = arith.constant 0 : index
    %4 = vector.load %arg3[%c0_7, %c0_8, %c0_9] : memref<2x16x128xf32, #tpu.memory_space<vmem>>, vector<2x16x128xf32>
    %5 = arith.addf %3, %4 : vector<2x16x128xf32>
    %6 = vector.shape_cast %5 : vector<2x16x128xf32> to vector<32x128xf32>
    %cst_10 = arith.constant dense<0.000000e+00> : vector<32x128xf32>
    %7 = tpu.matmul %6, %2, %cst_10 {dimension_numbers = #tpu.dot_dimension_numbers<[1], [0], [0], [1], [0, 0, 1, 1], [], []>} : vector<32x128xf32>, vector<128x128xf32>, vector<32x128xf32> -> vector<32x128xf32>
    %cst_11 = arith.constant 0.000000e+00 : f32
    %8 = vector.broadcast %cst_11 : f32 to vector<32x128xf32>
    %9 = arith.maximumf %7, %8 : vector<32x128xf32>
    %10 = vector.shape_cast %9 : vector<32x128xf32> to vector<2x16x128xf32>
    %c0_12 = arith.constant 0 : index
    %c0_13 = arith.constant 0 : index
    %c0_14 = arith.constant 0 : index
    %11 = vector.load %arg5[%c0_12, %c0_13, %c0_14] : memref<2x16x128xf32, #tpu.memory_space<vmem>>, vector<2x16x128xf32>
    tpu.vector_store %arg5[%c0_12, %c0_13, %c0_14], %10 {strides = array<i32>} : memref<2x16x128xf32, #tpu.memory_space<vmem>>, vector<2x16x128xf32>,
    return
  }
  func.func @transform_0(%arg0: i32) -> (i32, i32, i32) {
    %c0_i32 = arith.constant 0 : i32
    %c0_i32_0 = arith.constant 0 : i32
    %c0_i32_1 = arith.constant 0 : i32
    return %arg0, %c0_i32, %c0_i32_0 : i32, i32, i32
  }
  func.func @transform_1(%arg0: i32) -> (i32, i32, i32) {
    %c0_i32 = arith.constant 0 : i32
    %c0_i32_0 = arith.constant 0 : i32
    %c0_i32_1 = arith.constant 0 : i32
    return %arg0, %c0_i32, %c0_i32_0 : i32, i32, i32
  }
  func.func @transform_2(%arg0: i32) -> (i32, i32, i32) {
    %c0_i32 = arith.constant 0 : i32
    %c0_i32_0 = arith.constant 0 : i32
    %c0_i32_1 = arith.constant 0 : i32
    return %arg0, %c0_i32, %c0_i32_0 : i32, i32, i32
  }
  func.func @transform_3(%arg0: i32) -> (i32, i32) {
    %c0_i32 = arith.constant 0 : i32
    %c0_i32_0 = arith.constant 0 : i32
    %c0_i32_1 = arith.constant 0 : i32
    return %c0_i32, %c0_i32_0 : i32, i32
  }
  func.func @transform_4(%arg0: i32) -> (i32, i32, i32) {
    %c0_i32 = arith.constant 0 : i32
    %c0_i32_0 = arith.constant 0 : i32
    %c0_i32_1 = arith.constant 0 : i32
    return %arg0, %c0_i32, %c0_i32_0 : i32, i32, i32
  }
}

</mosaic_0001>

<bundles_post_ra>
// kernel: tpu_custom_call.1
= control target key start
LH: loop header
LB: loop body
LE: loop exit
PB: predicated region body
PF: predicated region fallthrough
CT: control target
= control target key end

     0   :  { %9 = vsyncpa [#allocation3], 0  ;;  %s897_s0 = inlined_call_operand.hbm [shape: f32[2,16,128], index: 0, kind: input, shape index: {}]   ;;  %s898_s1 = inlined_call_operand.hbm [shape: f32[2,128,128], index: 1, kind: input, shape index: {}]   ;;  %s899_s2 = inlined_call_operand.hbm [shape: f32[2,16,128], index: 2, kind: input, shape index: {}]   ;;  %s900_s3 = inlined_call_operand.hbm [shape: f32[128,128], index: 3, kind: input, shape index: {}]   ;;  %s901_s4 = inlined_call_operand.hbm [shape: f32[2,16,128], index: 4, kind: output, shape index: {}]  }
   0x1   :  { %10 = vsyncpa [#allocation6], 0 }
   0x2   :  { %11 = vsyncpa [#allocation9], 0 }
   0x3   :  { %12 = vsyncpa [#allocation4], 0  ;;  %s776_s15 = smov [#allocation5]   ;;  %s777_s17 = smov [#allocation2]  }
   0x4   :  { %s30_s16 = sshll.u32 %s776_s15, 4  ;;  %s18_s18 = sshll.u32 %s777_s17, 4  ;;  %s31_s16 = int_to_ptr.vmem [resolvable:$true] %s30_s16  ;;  %s808_s18 = int_to_ptr.vmem [resolvable:$true] %s18_s18 }
   0x5   :  { %s658_s21 = scalar_lea.hbm %s898_s1, 4096 }
   0x6   :  { %p659_p0 = scmp.ne.s32.totalorder %s898_s1, %s658_s21  ;;  %p662_p1 = scmp.lt.u32.totalorder %s658_s21, %s898_s1 }
   0x8   :  { %p664_p2 = pnand %p662_p1, %p659_p0 }
   0xa   :  { %667 = shalt.err (!%p664_p2)
}
   0xb   :  { %s668_s26 = scalar_lea.vmem %s31_s16, 4096  ;;  %p673_p4 = scmp.lt.s32.totalorder %s31_s16, %s31_s16 }
   0xc   :  { %p669_p3 = scmp.ne.s32.totalorder %s31_s16, %s668_s26  ;;  %p674_p5 = scmp.lt.s32.totalorder %s668_s26, %s668_s26 }
   0xe   :  { %p675_p6 = por %p674_p5, %p673_p4 }
  0x10   :  { %p676_p7 = pnand %p675_p6, %p669_p3 }
  0x12   :  { %679 = shalt.err (!%p676_p7)
}
  0x13   :  { %s778_s27 = smov 128   ;;  %s779_s28 = smov 8  }
  0x14   :  { %36 = dma.hbm_to_vmem [thread:$0]  %s898_s1, 4096, %s31_s16, [#allocation6], %s778_s27, %s778_s27, %s779_s28  }
  0x15   :  { %s680_s7 = scalar_lea.hbm %s897_s0, 512 }
  0x16   :  { %p681_p8 = scmp.ne.s32.totalorder %s897_s0, %s680_s7  ;;  %p684_p9 = scmp.lt.u32.totalorder %s680_s7, %s897_s0 }
  0x18   :  { %p686_p10 = pnand %p684_p9, %p681_p8 }
  0x1a   :  { %689 = shalt.err (!%p686_p10)
}
  0x1b   :  { %s690_s12 = scalar_lea.vmem %s808_s18, 512  ;;  %p695_p12 = scmp.lt.s32.totalorder %s808_s18, %s808_s18 }
  0x1c   :  { %p691_p11 = scmp.ne.s32.totalorder %s808_s18, %s690_s12  ;;  %p696_p13 = scmp.lt.s32.totalorder %s690_s12, %s690_s12 }
  0x1e   :  { %p697_p0 = por %p696_p13, %p695_p12 }
  0x20   :  { %p698_p1 = pnand %p697_p0, %p691_p11 }
  0x22   :  { %701 = shalt.err (!%p698_p1)
}
  0x23   :  { %24 = dma.hbm_to_vmem [thread:$0]  %s897_s0, 512, %s808_s18, [#allocation3], %s778_s27, %s778_s27, %s779_s28  }
  0x24   :  { %s780_s14 = smov [#allocation7]   ;;  %s781_s16 = smov [#allocation8]  }
  0x25   :  { %s42_s15 = sshll.u32 %s780_s14, 4  ;;  %s54_s17 = sshll.u32 %s781_s16, 4  ;;  %s43_s15 = int_to_ptr.vmem [resolvable:$true] %s42_s15  ;;  %s845_s17 = int_to_ptr.vmem [resolvable:$true] %s54_s17 }
  0x26   :  { %s702_s21 = scalar_lea.hbm %s899_s2, 512 }
  0x27   :  { %p703_p2 = scmp.ne.s32.totalorder %s899_s2, %s702_s21  ;;  %p706_p3 = scmp.lt.u32.totalorder %s702_s21, %s899_s2 }
  0x29   :  { %p708_p4 = pnand %p706_p3, %p703_p2 }
  0x2b   :  { %711 = shalt.err (!%p708_p4)
}
  0x2c   :  { %s712_s0 = scalar_lea.vmem %s43_s15, 512  ;;  %p717_p6 = scmp.lt.s32.totalorder %s43_s15, %s43_s15 }
  0x2d   :  { %p713_p5 = scmp.ne.s32.totalorder %s43_s15, %s712_s0  ;;  %p718_p7 = scmp.lt.s32.totalorder %s712_s0, %s712_s0 }
  0x2f   :  { %p719_p8 = por %p718_p7, %p717_p6 }
  0x31   :  { %p720_p9 = pnand %p719_p8, %p713_p5 }
  0x33   :  { %723 = shalt.err (!%p720_p9)
}
  0x34   :  { %48 = dma.hbm_to_vmem [thread:$0]  %s899_s2, 512, %s43_s15, [#allocation6], %s778_s27, %s778_s27, %s779_s28  }
  0x35   :  { %s724_s5 = scalar_lea.hbm %s900_s3, 2048 }
  0x36   :  { %p725_p10 = scmp.ne.s32.totalorder %s900_s3, %s724_s5  ;;  %p728_p11 = scmp.lt.u32.totalorder %s724_s5, %s900_s3 }
  0x38   :  { %p730_p12 = pnand %p728_p11, %p725_p10 }
  0x3a   :  { %733 = shalt.err (!%p730_p12)
}
  0x3b   :  { %s734_s10 = scalar_lea.vmem %s845_s17, 2048  ;;  %p739_p0 = scmp.lt.s32.totalorder %s845_s17, %s845_s17 }
  0x3c   :  { %p735_p13 = scmp.ne.s32.totalorder %s845_s17, %s734_s10  ;;  %p740_p1 = scmp.lt.s32.totalorder %s734_s10, %s734_s10 }
  0x3e   :  { %p741_p2 = por %p740_p1, %p739_p0 }
  0x40   :  { %p742_p3 = pnand %p741_p2, %p735_p13 }
  0x42   :  { %745 = shalt.err (!%p742_p3)
}
  0x43   :  { %60 = dma.hbm_to_vmem [thread:$0]  %s900_s3, 2048, %s845_s17, [#allocation9], %s778_s27, %s778_s27, %s779_s28  }
  0x44   :  { %768 = dma.done.wait [#allocation3], 512  }
  0x45   :  { %769 = vsyncadd [#allocation3], 4294966784 }
  0x46   :  { %770 = dma.done.wait [#allocation6], 4608  }
  0x47   :  { %771 = vsyncadd [#allocation6], 4294962688 }
  0x48   :  { %772 = dma.done.wait [#allocation9], 2048  }
  0x49   :  { %773 = vsyncadd [#allocation9], 4294965248  ;;  %v77_v0 = vld [vmem:[#allocation5] sm:$0xff]  ;;  %v78_v1 = vld [vmem:[#allocation5 + $0x8] sm:$0xff]  ;;  %s782_s3 = smov [#allocation10]  }
  0x4a   :  { %v79_v2 = vld [vmem:[#allocation5 + $0x10] sm:$0xff]  ;;  %v555_v3 = vpack.c.bf16 %v78_v1, %v77_v0  ;;  %v80_v4 = vld [vmem:[#allocation5 + $0x18] sm:$0xff]  ;;  %v81_v6 = vld [vmem:[#allocation5 + $0x20] sm:$0xff]  ;;  %s377_s12 = sshll.u32 %s782_s3, 4  ;;  %s378_s12 = int_to_ptr.vmem [resolvable:$true] %s377_s12 }
  0x4b   :  { %v559_v5 = vpack.c.bf16 %v80_v4, %v79_v2  ;;  %v82_v7 = vld [vmem:[#allocation5 + $0x28] sm:$0xff]  ;;  %v73_v9 = vld [vmem:[#allocation2] sm:$0xff]  ;;  %v83_v10 = vld [vmem:[#allocation5 + $0x30] sm:$0xff]  ;;  %s746_s1 = scalar_lea.vmem %s378_s12, 512  ;;  %p751_p5 = scmp.lt.s32.totalorder %s378_s12, %s378_s12 }
  0x4c   :  { %556 = vmatprep.subr.bf16.mxu1 %v555_v3  ;;  %v563_v8 = vpack.c.bf16 %v82_v7, %v81_v6  ;;  %v84_v11 = vld [vmem:[#allocation5 + $0x38] sm:$0xff]  ;;  %479 = vmatprep.mubr.f32.mxu1 %v73_v9  ;;  %v85_v13 = vld [vmem:[#allocation5 + $0x40] sm:$0xff]  ;;  %v86_v14 = vld [vmem:[#allocation5 + $0x48] sm:$0xff]  ;;  %p747_p4 = scmp.ne.s32.totalorder %s378_s12, %s746_s1  ;;  %p752_p6 = scmp.lt.s32.totalorder %s746_s1, %s746_s1 }
  0x4d   :  { %558 = vmatpush3.bf16.msra.mxu1 %v555_v3  ;;  %v567_v12 = vpack.c.bf16 %v84_v11, %v83_v10  ;;  %v109_v15 = vld [vmem:[#allocation8] sm:$0xff]  ;;  %v110_v16 = vld [vmem:[#allocation8 + $0x8] sm:$0xff]  ;;  %v111_v17 = vld [vmem:[#allocation8 + $0x10] sm:$0xff]  ;;  %v571_v18 = vpack.c.bf16 %v86_v14, %v85_v13 }
  0x4e   :  { %560 = vmatprep.subr.bf16.mxu1 %v559_v5  ;;  %v87_v19 = vld [vmem:[#allocation5 + $0x50] sm:$0xff]  ;;  %v619_v20 = vpack.c.bf16 %v110_v16, %v109_v15  ;;  %v112_v21 = vld [vmem:[#allocation8 + $0x18] sm:$0xff]  ;;  %v113_v24 = vld [vmem:[#allocation8 + $0x20] sm:$0xff]  ;;  %p753_p7 = por %p752_p6, %p751_p5 }
  0x4f   :  { %v88_v22 = vld [vmem:[#allocation5 + $0x58] sm:$0xff]  ;;  %v623_v23 = vpack.c.bf16 %v112_v21, %v111_v17  ;;  %v114_v25 = vld [vmem:[#allocation8 + $0x28] sm:$0xff]  ;;  %v89_v27 = vld [vmem:[#allocation5 + $0x60] sm:$0xff] }
  0x50   :  { %620 = vmatprep.subr.bf16.mxu0 %v619_v20  ;;  %v575_v26 = vpack.c.bf16 %v88_v22, %v87_v19  ;;  %v627_v28 = vpack.c.bf16 %v114_v25, %v113_v24  ;;  %v90_v29 = vld [vmem:[#allocation5 + $0x68] sm:$0xff]  ;;  %v115_v30 = vld [vmem:[#allocation8 + $0x30] sm:$0xff]  ;;  %v116_v31 = vld [vmem:[#allocation8 + $0x38] sm:$0xff]  ;;  %p754_p8 = pnand %p753_p7, %p747_p4 }
  0x51   :  { %562 = vmatpush3.bf16.msra.mxu1 %v559_v5  ;;  %622 = vmatpush3.bf16.msra.mxu0 %v619_v20  ;;  %v579_v32 = vpack.c.bf16 %v90_v29, %v89_v27  ;;  %v91_v33 = vld [vmem:[#allocation5 + $0x70] sm:$0xff]  ;;  %v631_v34 = vpack.c.bf16 %v116_v31, %v115_v30  ;;  %v92_v35 = vld [vmem:[#allocation5 + $0x78] sm:$0xff]  ;;  %v117_v36 = vld [vmem:[#allocation8 + $0x40] sm:$0xff] }
  0x52   :  { %564 = vmatprep.subr.bf16.mxu1 %v563_v8  ;;  %624 = vmatprep.subr.bf16.mxu0 %v623_v23  ;;  %v118_v37 = vld [vmem:[#allocation8 + $0x48] sm:$0xff]  ;;  %v583_v38 = vpack.c.bf16 %v92_v35, %v91_v33  ;;  %v93_v39 = vld [vmem:[#allocation5 + $0x80] sm:$0xff]  ;;  %v119_v42 = vld [vmem:[#allocation8 + $0x50] sm:$0xff] }
  0x53   :  { %v635_v40 = vpack.c.bf16 %v118_v37, %v117_v36  ;;  %v94_v41 = vld [vmem:[#allocation5 + $0x88] sm:$0xff]  ;;  %v120_v43 = vld [vmem:[#allocation8 + $0x58] sm:$0xff]  ;;  %v95_v46 = vld [vmem:[#allocation5 + $0x90] sm:$0xff] }
  0x54   :  { %v587_v44 = vpack.c.bf16 %v94_v41, %v93_v39  ;;  %v639_v45 = vpack.c.bf16 %v120_v43, %v119_v42  ;;  %v96_v47 = vld [vmem:[#allocation5 + $0x98] sm:$0xff]  ;;  %v121_v48 = vld [vmem:[#allocation8 + $0x60] sm:$0xff]  ;;  %v122_v49 = vld [vmem:[#allocation8 + $0x68] sm:$0xff] }
  0x55   :  { %566 = vmatpush3.bf16.msra.mxu1 %v563_v8  ;;  %626 = vmatpush3.bf16.msra.mxu0 %v623_v23  ;;  %v74_v50 = vld [vmem:[#allocation2 + $0x8] sm:$0xff]  ;;  %v591_v51 = vpack.c.bf16 %v96_v47, %v95_v46  ;;  %v75_v52 = vld [vmem:[#allocation2 + $0x10] sm:$0xff]  ;;  %v97_v53 = vld [vmem:[#allocation5 + $0xa0] sm:$0xff]  ;;  %v643_v55 = vpack.c.bf16 %v122_v49, %v121_v48 }
  0x56   :  { %568 = vmatprep.subr.bf16.mxu1 %v567_v12  ;;  %628 = vmatprep.subr.bf16.mxu0 %v627_v28  ;;  %v98_v54 = vld [vmem:[#allocation5 + $0xa8] sm:$0xff]  ;;  %v99_v57 = vld [vmem:[#allocation5 + $0xb0] sm:$0xff]  ;;  %v100_v58 = vld [vmem:[#allocation5 + $0xb8] sm:$0xff] }
  0x57   :  { %v595_v56 = vpack.c.bf16 %v98_v54, %v97_v53  ;;  %v599_v59 = vpack.c.bf16 %v100_v58, %v99_v57  ;;  %v101_v60 = vld [vmem:[#allocation5 + $0xc0] sm:$0xff]  ;;  %v102_v61 = vld [vmem:[#allocation5 + $0xc8] sm:$0xff]  ;;  %v103_v63 = vld [vmem:[#allocation5 + $0xd0] sm:$0xff] }
  0x58   :  { %v603_v62 = vpack.c.bf16 %v102_v61, %v101_v60  ;;  %v104_v0 = vld [vmem:[#allocation5 + $0xd8] sm:$0xff]  ;;  %v105_v2 = vld [vmem:[#allocation5 + $0xe0] sm:$0xff]  ;;  %v106_v3 = vld [vmem:[#allocation5 + $0xe8] sm:$0xff] }
  0x59   :  { %570 = vmatpush3.bf16.msra.mxu1 %v567_v12  ;;  %630 = vmatpush3.bf16.msra.mxu0 %v627_v28  ;;  %v607_v1 = vpack.c.bf16 %v104_v0, %v103_v63  ;;  %v611_v4 = vpack.c.bf16 %v106_v3, %v105_v2  ;;  %v107_v5 = vld [vmem:[#allocation5 + $0xf0] sm:$0xff]  ;;  %v108_v6 = vld [vmem:[#allocation5 + $0xf8] sm:$0xff]  ;;  %v126_v12 = vld [vmem:[#allocation7 + $0x8] sm:$0xff] }
  0x5a   :  { %572 = vmatprep.subr.bf16.mxu1 %v571_v18  ;;  %632 = vmatprep.subr.bf16.mxu0 %v631_v34  ;;  %v615_v7 = vpack.c.bf16 %v108_v6, %v107_v5  ;;  %v76_v8 = vld [vmem:[#allocation2 + $0x18] sm:$0xff]  ;;  %v123_v9 = vld [vmem:[#allocation8 + $0x70] sm:$0xff]  ;;  %v125_v13 = vld [vmem:[#allocation7] sm:$0xff] }
  0x5b   :  { %v124_v10 = vld [vmem:[#allocation8 + $0x78] sm:$0xff] }
  0x5c   :  { %v647_v11 = vpack.c.bf16 %v124_v10, %v123_v9  ;;  %v128_v19 = vld [vmem:[#allocation7 + $0x18] sm:$0xff] }
  0x5d   :  { %574 = vmatpush3.bf16.msra.mxu1 %v571_v18  ;;  %634 = vmatpush3.bf16.msra.mxu0 %v631_v34  ;;  %v127_v18 = vld [vmem:[#allocation7 + $0x10] sm:$0xff] }
  0x5e   :  { %576 = vmatprep.subr.bf16.mxu1 %v575_v26  ;;  %636 = vmatprep.subr.bf16.mxu0 %v635_v40 }
  0x61   :  { %578 = vmatpush3.bf16.msra.mxu1 %v575_v26  ;;  %638 = vmatpush3.bf16.msra.mxu0 %v635_v40 }
  0x62   :  { %580 = vmatprep.subr.bf16.mxu1 %v579_v32  ;;  %640 = vmatprep.subr.bf16.mxu0 %v639_v45 }
  0x65   :  { %582 = vmatpush3.bf16.msra.mxu1 %v579_v32  ;;  %642 = vmatpush3.bf16.msra.mxu0 %v639_v45 }
  0x66   :  { %584 = vmatprep.subr.bf16.mxu1 %v583_v38  ;;  %644 = vmatprep.subr.bf16.mxu0 %v643_v55 }
  0x69   :  { %586 = vmatpush3.bf16.msra.mxu1 %v583_v38  ;;  %646 = vmatpush3.bf16.msra.mxu0 %v643_v55 }
  0x6a   :  { %588 = vmatprep.subr.bf16.mxu1 %v587_v44  ;;  %648 = vmatprep.subr.bf16.mxu0 %v647_v11 }
  0x6c   :  { %480 = vmatmul.mubr.f32.vlgmr.msra.gmra.mrb[0].mxu1 %v74_v50 }
  0x6d   :  { %590 = vmatpush3.bf16.msra.mxu1 %v587_v44  ;;  %514 = vmatprep.mubr.f32.mxu1 %v75_v52 }
  0x6e   :  { %592 = vmatprep.subr.bf16.mxu1 %v591_v51  ;;  %650 = vmatpush3.bf16.msra.mxu0 %v647_v11 }
  0x71   :  { %594 = vmatpush3.bf16.msra.mxu1 %v591_v51 }
  0x72   :  { %596 = vmatprep.subr.bf16.mxu1 %v595_v56 }
  0x75   :  { %598 = vmatpush3.bf16.msra.mxu1 %v595_v56 }
  0x76   :  { %600 = vmatprep.subr.bf16.mxu1 %v599_v59 }
  0x79   :  { %602 = vmatpush3.bf16.msra.mxu1 %v599_v59 }
  0x7a   :  { %604 = vmatprep.subr.bf16.mxu1 %v603_v62 }
  0x7d   :  { %606 = vmatpush3.bf16.msra.mxu1 %v603_v62 }
  0x7e   :  { %608 = vmatprep.subr.bf16.mxu1 %v607_v1 }
  0x81   :  { %610 = vmatpush3.bf16.msra.mxu1 %v607_v1 }
  0x82   :  { %612 = vmatprep.subr.bf16.mxu1 %v611_v4 }
  0x85   :  { %614 = vmatpush3.bf16.msra.mxu1 %v611_v4 }
  0x86   :  { %616 = vmatprep.subr.bf16.mxu1 %v615_v7 }
  0x89   :  { %618 = vmatpush3.bf16.msra.mxu1 %v615_v7 }
  0x8c   :  { %515 = vmatmul.mubr.f32.vlgmr.msra.gmra.mrb[2].mxu1 %v76_v8 }
 0x13f   :  { %v481_v14 = vpop.f32.mrb[0].mxu1 }
 0x140   :  { %v201_v15 = vadd.f32 %v481_v14, %v126_v12  ;;  %v195_v16 = vpop.f32.mrb[1].mxu1 }
 0x141   :  { %v196_v17 = vadd.f32 %v195_v16, %v125_v13 }
 0x143   :  { %549 = vmatprep.mubr.f32.mxu0 %v196_v17 }
 0x144   :  { %550 = vmatmul.mubr.f32.vlgmr.msra.gmra.mrb[0].mxu0 %v201_v15 }
 0x15f   :  { %v516_v20 = vpop.f32.mrb[2].mxu1 }
 0x160   :  { %v270_v21 = vpop.f32.mrb[3].mxu1  ;;  %v276_v23 = vadd.f32 %v516_v20, %v128_v19 }
 0x161   :  { %v271_v22 = vadd.f32 %v270_v21, %v127_v18 }
 0x163   :  { %552 = vmatprep.mubr.f32.mxu0 %v271_v22 }
 0x164   :  { %553 = vmatmul.mubr.f32.gmra.mrb[2].mxu0 %v276_v23 }
 0x217   :  { %v551_v24 = vpop.f32.mrb[0].mxu0 }
 0x218   :  { %v365_v25 = vmax.f32 %v551_v24, 0.0  ;;  %v345_v26 = vpop.f32.mrb[1].mxu0 }
 0x219   :  { %v364_v27 = vmax.f32 %v345_v26, 0.0 }
 0x21a   :  { %369 = vst [vmem:[#allocation10 + $0x8] sm:$0xff] %v365_v25 }
 0x21b   :  { %368 = vst [vmem:[#allocation10] sm:$0xff] %v364_v27 }
 0x237   :  { %v554_v28 = vpop.f32.mrb[2].mxu0 }
 0x238   :  { %v367_v29 = vmax.f32 %v554_v28, 0.0  ;;  %v355_v30 = vpop.f32.mrb[3].mxu0 }
 0x239   :  { %v366_v31 = vmax.f32 %v355_v30, 0.0 }
 0x23a   :  { %371 = vst [vmem:[#allocation10 + $0x18] sm:$0xff] %v367_v29 }
 0x23b   :  { %370 = vst [vmem:[#allocation10 + $0x10] sm:$0xff] %v366_v31 }
 0x23c   :  { %757 = shalt.err (!%p754_p8)
}
 0x23d   :  { %s758_s15 = scalar_lea.hbm %s901_s4, 512 }
 0x23e   :  { %p759_p9 = scmp.ne.s32.totalorder %s901_s4, %s758_s15  ;;  %p762_p10 = scmp.lt.u32.totalorder %s758_s15, %s901_s4 }
 0x240   :  { %p764_p11 = pnand %p762_p10, %p759_p9 }
 0x242   :  { %767 = shalt.err (!%p764_p11)
}
 0x243   :  { %383 = dma.vmem_to_hbm [thread:$0]  %s378_s12, 512, %s901_s4, [#allocation4], %s778_s27, %s778_s27, %s779_s28  }
 0x244   :  { %774 = dma.done.wait [#allocation4], 512  }
 0x245   :  { %775 = vsyncadd [#allocation4], 4294966784 }
 0x246   :  { %387 = vsyncpa [#allocation3], 1 }
 0x247   :  { %388 = vsyncpa [#allocation6], 1 }
 0x248   :  { %389 = vsyncpa [#allocation9], 1 }
 0x249   :  { %390 = vsyncpa [#allocation4], 1 }

</bundles_post_ra>
